<compile_context>
chip_gen: v7x
topology: tpu7x:2x2x1
jax: 0.10.0
libtpu: 0.0.40
codegen_flags: <defaults>
</compile_context>

<pallas_src>
import functools

import jax
import jax.numpy as jnp
from jax.experimental import pallas as pl
from jax.experimental.pallas import tpu as pltpu


def _layernorm_kernel(x_ref, scale_ref, shift_ref, o_ref, *, emb_dim, eps):
    """General path: emb_dim is the full lane axis (>= 128, or narrow-but-odd)."""
    x = x_ref[...].astype(jnp.float32)
    # Fused single pass: both reductions are issued before any dependent
    # elementwise work, so the second XLU reduce is not serialized behind a
    # centering pass over the whole tile.
    s = jnp.sum(x, axis=-1, keepdims=True)
    sq = jnp.sum(x * x, axis=-1, keepdims=True)
    inv_e = 1.0 / float(emb_dim)
    mean = s * inv_e
    var = sq * inv_e - mean * mean          # population variance (unbiased=False)
    inv_std = jax.lax.rsqrt(var + eps)
    scale = scale_ref[...].astype(jnp.float32)
    shift = shift_ref[...].astype(jnp.float32)
    o_ref[...] = (scale * (x - mean) * inv_std + shift).astype(o_ref.dtype)


def _layernorm_fold_kernel(x_ref, scale_ref, shift_ref, seg_ref, o_ref, *,
                           emb_dim, eps):
    """Lane-folded path: each physical row holds G = width/emb_dim logical rows.

    seg_ref is a (width, width) block-diagonal ones matrix; x @ seg computes the
    per-group (per-logical-row) sums and broadcasts them back across each
    emb_dim-lane group in a single MXU op — no cross-lane XLU reductions and no
    sub-128-lane layouts anywhere.
    """
    x = x_ref[...].astype(jnp.float32)
    seg = seg_ref[...]
    s = jnp.dot(x, seg, precision=jax.lax.Precision.HIGHEST,
                preferred_element_type=jnp.float32)
    sq = jnp.dot(x * x, seg, precision=jax.lax.Precision.HIGHEST,
                 preferred_element_type=jnp.float32)
    inv_e = 1.0 / float(emb_dim)
    mean = s * inv_e
    var = sq * inv_e - mean * mean
    inv_std = jax.lax.rsqrt(var + eps)
    scale = scale_ref[...].astype(jnp.float32)
    shift = shift_ref[...].astype(jnp.float32)
    o_ref[...] = (scale * (x - mean) * inv_std + shift).astype(o_ref.dtype)


def layer_norm(x, scale, shift, *, eps=1e-5, row_tile=None):
    """LayerNorm over the last axis of x. x: [..., emb_dim]; scale/shift: [emb_dim].

    row_tile is a tunable; if None it is auto-sized to ~4 MiB per input block
    (memory-bound streaming kernel — tile size is the main lever).
    """
    emb_dim = x.shape[-1]
    orig_shape = x.shape
    orig_dtype = x.dtype
    x2 = x.reshape(-1, emb_dim)
    rows = x2.shape[0]

    # ---- Lane folding for narrow widths (keeps lanes / output stores dense).
    fold = (emb_dim < 128) and (128 % emb_dim == 0)
    if fold:
        g = 128 // emb_dim
        rows_f = pl.cdiv(rows, g) * g
        if rows_f != rows:
            x2 = jnp.pad(x2, ((0, rows_f - rows), (0, 0)))
        width = g * emb_dim                      # == 128
        x2 = x2.reshape(rows_f // g, width)
        scale_w = jnp.tile(scale.reshape(-1), g).reshape(1, width)
        shift_w = jnp.tile(shift.reshape(-1), g).reshape(1, width)
        work_rows = rows_f // g
    else:
        # emb_dim >= 128 (typical transformer widths), or a narrow width that
        # does not divide 128 (correct but runs with partially-idle lanes).
        width = emb_dim
        scale_w = scale.reshape(1, width)
        shift_w = shift.reshape(1, width)
        work_rows = rows

    # ---- Row-tile selection (sublane-packing aligned, VMEM-budgeted).
    itemsize = jnp.dtype(orig_dtype).itemsize
    sub = max(8, 32 // max(1, itemsize))         # 8 f32 / 16 bf16 / 32 int8-fp8
    if row_tile is None:
        # ~4 MiB per input block: large enough to amortize the ~0.35us per-grid-
        # step overhead and ramp the DMA engines; small enough that double-
        # buffered in+out streams plus f32 intermediates fit scoped VMEM on
        # v5e / v6e / v7x.
        target_bytes = 4 * 1024 * 1024
        row_tile = (target_bytes // max(1, width * itemsize)) // sub * sub
        row_tile = max(sub, min(row_tile, 2048))
    else:
        row_tile = max(sub, (row_tile // sub) * sub)
    rows_min = pl.cdiv(work_rows, sub) * sub
    row_tile = min(row_tile, rows_min)

    # Pad rows up to a tile multiple (never fall back to one whole-array block).
    rows_p = pl.cdiv(work_rows, row_tile) * row_tile
    if rows_p != work_rows:
        x2 = jnp.pad(x2, ((0, rows_p - work_rows), (0, 0)))
    grid = (rows_p // row_tile,)

    # ---- VMEM budget: in+out streams double-buffered + f32 intermediates +
    # params/headroom. Capped at 48 MiB to stay safe under v7x's 64 MiB VMEM.
    block_bytes = row_tile * width * itemsize
    block_f32 = row_tile * width * 4
    vmem_limit = int(min(48 * 2**20,
                         max(16 * 2**20, 4 * block_bytes + 4 * block_f32 + 4 * 2**20)))

    in_specs = [
        pl.BlockSpec((row_tile, width), lambda i: (i, 0)),
        pl.BlockSpec((1, width), lambda i: (0, 0)),   # scale: DMA'd once
        pl.BlockSpec((1, width), lambda i: (0, 0)),   # shift: DMA'd once
    ]
    operands = [x2, scale_w, shift_w]

    if fold:
        lane_grp = jnp.arange(width, dtype=jnp.int32) // emb_dim
        seg = (lane_grp[:, None] == lane_grp[None, :]).astype(jnp.float32)
        in_specs.append(pl.BlockSpec((width, width), lambda i: (0, 0)))
        operands.append(seg)
        kernel = functools.partial(_layernorm_fold_kernel, emb_dim=emb_dim, eps=eps)
    else:
        kernel = functools.partial(_layernorm_kernel, emb_dim=emb_dim, eps=eps)

    out = pl.pallas_call(
        kernel,
        out_shape=jax.ShapeDtypeStruct((rows_p, width), orig_dtype),
        grid_spec=pltpu.PrefetchScalarGridSpec(
            num_scalar_prefetch=0,
            grid=grid,
            in_specs=in_specs,
            out_specs=pl.BlockSpec((row_tile, width), lambda i: (i, 0)),
        ),
        compiler_params=pltpu.CompilerParams(
            dimension_semantics=("parallel",),   # shards rows across TCs on v7x
            vmem_limit_bytes=vmem_limit,
        ),
    )(*operands)

    if fold:
        out = out.reshape(-1, emb_dim)[:rows]
    else:
        out = out[:rows]
    return out.reshape(orig_shape)


if __name__ == "__main__":
    def reference(x, scale, shift, eps=1e-5):
        mean = x.mean(axis=-1, keepdims=True)
        var = x.var(axis=-1, keepdims=True)          # population variance
        return scale * ((x - mean) / jnp.sqrt(var + eps)) + shift

    key = jax.random.PRNGKey(0)
    k0, k1 = jax.random.split(key)

    # Narrow width (exercises the lane-folding path).
    emb_dim = 32
    batch, seq = 2, 8
    scale = jnp.ones((emb_dim,), dtype=jnp.float32)
    shift = jnp.zeros((emb_dim,), dtype=jnp.float32)
    x = jax.random.normal(k0, (batch, seq, emb_dim), dtype=jnp.float32)
    out = jax.block_until_ready(layer_norm(x, scale, shift))
    assert out.shape == x.shape
    assert jnp.allclose(out, reference(x, scale, shift), atol=1e-4, rtol=1e-4), \
        "mismatch vs reference (narrow / folded path)"

    # Wide width (exercises the general reduction path).
    emb_dim2 = 128
    scale2 = jnp.ones((emb_dim2,), dtype=jnp.float32)
    shift2 = jnp.zeros((emb_dim2,), dtype=jnp.float32)
    x_wide = jax.random.normal(k1, (batch, seq, emb_dim2), dtype=jnp.float32)
    out2 = jax.block_until_ready(layer_norm(x_wide, scale2, shift2))
    assert jnp.allclose(out2, reference(x_wide, scale2, shift2), atol=1e-4, rtol=1e-4), \
        "mismatch vs reference (wide path)"

    print("KERNEL_OK")
</pallas_src>

<mosaic_0001>
module attributes {stable_mosaic.version = 11 : i64} {
  func.func @_layernorm_fold_kernel(%arg0: i32, %arg1: memref<8x128xf32, #tpu.memory_space<vmem>>, %arg2: memref<1x128xf32, #tpu.memory_space<vmem>>, %arg3: memref<1x128xf32, #tpu.memory_space<vmem>>, %arg4: memref<128x128xf32, #tpu.memory_space<vmem>>, %arg5: memref<8x128xf32, #tpu.memory_space<vmem>>) attributes {dimension_semantics = [#tpu.dimension_semantics<parallel>], iteration_bounds = array<i64: 1>, scalar_prefetch = 0 : i64, scratch_operands = 0 : i64, tpu.core_type = #tpu.core_type<tc>, window_params = [{transform_indices = @transform_0, window_bounds = array<i64: 8, 128>}, {pipeline_mode = #tpu.pipeline_mode<synchronous>, transform_indices = @transform_1, window_bounds = array<i64: 1, 128>}, {pipeline_mode = #tpu.pipeline_mode<synchronous>, transform_indices = @transform_2, window_bounds = array<i64: 1, 128>}, {pipeline_mode = #tpu.pipeline_mode<synchronous>, transform_indices = @transform_3, window_bounds = array<i64: 128, 128>}, {transform_indices = @transform_4, window_bounds = array<i64: 8, 128>}]} {
    %c0 = arith.constant 0 : index
    %c0_0 = arith.constant 0 : index
    %0 = vector.load %arg1[%c0, %c0_0] : memref<8x128xf32, #tpu.memory_space<vmem>>, vector<8x128xf32>
    %c0_1 = arith.constant 0 : index
    %c0_2 = arith.constant 0 : index
    %1 = vector.load %arg4[%c0_1, %c0_2] : memref<128x128xf32, #tpu.memory_space<vmem>>, vector<128x128xf32>
    %cst = arith.constant dense<0.000000e+00> : vector<8x128xf32>
    %2 = tpu.matmul %0, %1, %cst {dimension_numbers = #tpu.dot_dimension_numbers<[1], [0], [0], [1], [0, 0, 1, 1], [], []>, precision = #tpu.contract_precision<fp32>} : vector<8x128xf32>, vector<128x128xf32>, vector<8x128xf32> -> vector<8x128xf32>
    %3 = arith.mulf %0, %0 : vector<8x128xf32>
    %cst_3 = arith.constant dense<0.000000e+00> : vector<8x128xf32>
    %4 = tpu.matmul %3, %1, %cst_3 {dimension_numbers = #tpu.dot_dimension_numbers<[1], [0], [0], [1], [0, 0, 1, 1], [], []>, precision = #tpu.contract_precision<fp32>} : vector<8x128xf32>, vector<128x128xf32>, vector<8x128xf32> -> vector<8x128xf32>
    %cst_4 = arith.constant 3.125000e-02 : f32
    %5 = vector.broadcast %cst_4 : f32 to vector<8x128xf32>
    %6 = arith.mulf %2, %5 : vector<8x128xf32>
    %cst_5 = arith.constant 3.125000e-02 : f32
    %7 = vector.broadcast %cst_5 : f32 to vector<8x128xf32>
    %8 = arith.mulf %4, %7 : vector<8x128xf32>
    %9 = arith.mulf %6, %6 : vector<8x128xf32>
    %10 = arith.subf %8, %9 : vector<8x128xf32>
    %cst_6 = arith.constant 9.99999974E-6 : f32
    %11 = vector.broadcast %cst_6 : f32 to vector<8x128xf32>
    %12 = arith.addf %10, %11 : vector<8x128xf32>
    %13 = math.rsqrt %12 : vector<8x128xf32>
    %c0_7 = arith.constant 0 : index
    %c0_8 = arith.constant 0 : index
    %14 = vector.load %arg2[%c0_7, %c0_8] : memref<1x128xf32, #tpu.memory_space<vmem>>, vector<1x128xf32>
    %c0_9 = arith.constant 0 : index
    %c0_10 = arith.constant 0 : index
    %15 = vector.load %arg3[%c0_9, %c0_10] : memref<1x128xf32, #tpu.memory_space<vmem>>, vector<1x128xf32>
    %16 = arith.subf %0, %6 : vector<8x128xf32>
    %17 = vector.broadcast %14 : vector<1x128xf32> to vector<8x128xf32>
    %18 = arith.mulf %17, %16 : vector<8x128xf32>
    %19 = arith.mulf %18, %13 : vector<8x128xf32>
    %20 = vector.broadcast %15 : vector<1x128xf32> to vector<8x128xf32>
    %21 = arith.addf %19, %20 : vector<8x128xf32>
    %c0_11 = arith.constant 0 : index
    %c0_12 = arith.constant 0 : index
    %22 = vector.load %arg5[%c0_11, %c0_12] : memref<8x128xf32, #tpu.memory_space<vmem>>, vector<8x128xf32>
    tpu.vector_store %arg5[%c0_11, %c0_12], %21 {strides = array<i32>} : memref<8x128xf32, #tpu.memory_space<vmem>>, vector<8x128xf32>,
    return
  }
  func.func @transform_0(%arg0: i32) -> (i32, i32) {
    %c0_i32 = arith.constant 0 : i32
    %c0_i32_0 = arith.constant 0 : i32
    return %arg0, %c0_i32 : i32, i32
  }
  func.func @transform_1(%arg0: i32) -> (i32, i32) {
    %c0_i32 = arith.constant 0 : i32
    %c0_i32_0 = arith.constant 0 : i32
    %c0_i32_1 = arith.constant 0 : i32
    return %c0_i32, %c0_i32_0 : i32, i32
  }
  func.func @transform_2(%arg0: i32) -> (i32, i32) {
    %c0_i32 = arith.constant 0 : i32
    %c0_i32_0 = arith.constant 0 : i32
    %c0_i32_1 = arith.constant 0 : i32
    return %c0_i32, %c0_i32_0 : i32, i32
  }
  func.func @transform_3(%arg0: i32) -> (i32, i32) {
    %c0_i32 = arith.constant 0 : i32
    %c0_i32_0 = arith.constant 0 : i32
    %c0_i32_1 = arith.constant 0 : i32
    return %c0_i32, %c0_i32_0 : i32, i32
  }
  func.func @transform_4(%arg0: i32) -> (i32, i32) {
    %c0_i32 = arith.constant 0 : i32
    %c0_i32_0 = arith.constant 0 : i32
    return %arg0, %c0_i32 : i32, i32
  }
}

</mosaic_0001>

<bundles_post_ra>
// kernel: tpu_custom_call.1
= control target key start
LH: loop header
LB: loop body
LE: loop exit
PB: predicated region body
PF: predicated region fallthrough
CT: control target
= control target key end

     0   :  { %9 = vsyncpa [#allocation3], 0  ;;  %s2843_s0 = inlined_call_operand.hbm [shape: f32[8,128], index: 0, kind: input, shape index: {}]   ;;  %s2844_s1 = inlined_call_operand.vmem [shape: f32[1,128], index: 1, kind: input, shape index: {}]   ;;  %s2845_s2 = inlined_call_operand.vmem [shape: f32[1,128], index: 2, kind: input, shape index: {}]   ;;  %s2846_s3 = inlined_call_operand.hbm [shape: f32[128,128], index: 3, kind: input, shape index: {}]   ;;  %s2847_s4 = inlined_call_operand.hbm [shape: f32[8,128], index: 4, kind: output, shape index: {}]  }
   0x1   :  { %10 = vsyncpa [#allocation6], 0 }
   0x2   :  { %11 = vsyncpa [#allocation4], 0  ;;  %s2401_s15 = smov [#allocation2]   ;;  %s2402_s17 = smov [#allocation5]  }
   0x3   :  { %s18_s16 = sshll.u32 %s2401_s15, 4  ;;  %s31_s18 = sshll.u32 %s2402_s17, 4  ;;  %s19_s16 = int_to_ptr.vmem [resolvable:$true] %s18_s16  ;;  %s2434_s18 = int_to_ptr.vmem [resolvable:$true] %s31_s18 }
   0x4   :  { %s2329_s21 = scalar_lea.hbm %s2843_s0, 128 }
   0x5   :  { %p2330_p0 = scmp.ne.s32.totalorder %s2843_s0, %s2329_s21  ;;  %p2333_p1 = scmp.lt.u32.totalorder %s2329_s21, %s2843_s0 }
   0x7   :  { %p2335_p2 = pnand %p2333_p1, %p2330_p0 }
   0x9   :  { %2338 = shalt.err (!%p2335_p2)
}
   0xa   :  { %s2339_s26 = scalar_lea.vmem %s19_s16, 128  ;;  %p2344_p4 = scmp.lt.s32.totalorder %s19_s16, %s19_s16 }
   0xb   :  { %p2340_p3 = scmp.ne.s32.totalorder %s19_s16, %s2339_s26  ;;  %p2345_p5 = scmp.lt.s32.totalorder %s2339_s26, %s2339_s26 }
   0xd   :  { %p2346_p6 = por %p2345_p5, %p2344_p4 }
   0xf   :  { %p2347_p7 = pnand %p2346_p6, %p2340_p3 }
  0x11   :  { %2350 = shalt.err (!%p2347_p7)
}
  0x12   :  { %21 = dma.hbm_to_vmem [thread:$0]  %s2843_s0, 128, %s19_s16, [#allocation3]  }
  0x13   :  { %s2351_s5 = scalar_lea.hbm %s2846_s3, 2048 }
  0x14   :  { %p2352_p8 = scmp.ne.s32.totalorder %s2846_s3, %s2351_s5  ;;  %p2355_p9 = scmp.lt.u32.totalorder %s2351_s5, %s2846_s3 }
  0x16   :  { %p2357_p10 = pnand %p2355_p9, %p2352_p8 }
  0x18   :  { %2360 = shalt.err (!%p2357_p10)
}
  0x19   :  { %s2361_s10 = scalar_lea.vmem %s2434_s18, 2048  ;;  %p2366_p12 = scmp.lt.s32.totalorder %s2434_s18, %s2434_s18 }
  0x1a   :  { %p2362_p11 = scmp.ne.s32.totalorder %s2434_s18, %s2361_s10  ;;  %p2367_p13 = scmp.lt.s32.totalorder %s2361_s10, %s2361_s10 }
  0x1c   :  { %p2368_p0 = por %p2367_p13, %p2366_p12 }
  0x1e   :  { %p2369_p1 = pnand %p2368_p0, %p2362_p11 }
  0x20   :  { %2372 = shalt.err (!%p2369_p1)
}
  0x21   :  { %s2403_s0 = smov 128   ;;  %s2404_s11 = smov 8  }
  0x22   :  { %37 = dma.hbm_to_vmem [thread:$0]  %s2846_s3, 2048, %s2434_s18, [#allocation6], %s2403_s0, %s2403_s0, %s2404_s11  }
  0x23   :  { %2395 = dma.done.wait [#allocation3], 128  }
  0x24   :  { %2396 = vsyncadd [#allocation3], 4294967168 }
  0x25   :  { %2397 = dma.done.wait [#allocation6], 2048  }
  0x26   :  { %2398 = vsyncadd [#allocation6], 4294965248  ;;  %v2405_v0 = vmov 0.0|0.0   ;;  %vm2406_vm0 = vmmov 0   ;;  %v2407_v1 = vmov 0.0   ;;  %v45_v2 = vld [vmem:[#allocation5] sm:$0xff] }
  0x27   :  { %2011 = vmatprep.subr.bf16.mxu0 %v2405_v0  ;;  %2155 = vmatprep.subr.bf16.mxu1 %v2405_v0  ;;  %v46_v3 = vld [vmem:[#allocation5 + $0x8] sm:$0xff]  ;;  %v47_v4 = vld [vmem:[#allocation5 + $0x10] sm:$0xff]  ;;  %v62_v5 = vand.u32 4294901760, %v45_v2  ;;  %v48_v7 = vld [vmem:[#allocation5 + $0x18] sm:$0xff]  ;;  %s2408_s17 = smov [#allocation7]  }
  0x28   :  { %1623 = vmatprep.mubr.msk.f32.mxu0 %vm2406_vm0, %v2407_v1  ;;  %1833 = vmatprep.mubr.msk.f32.mxu1 %vm2406_vm0, %v2407_v1  ;;  %v65_v6 = vand.u32 4294901760, %v46_v3  ;;  %v68_v8 = vand.u32 4294901760, %v47_v4  ;;  %v71_v9 = vand.u32 4294901760, %v48_v7  ;;  %v2471_v10 = vld [vmem:[#allocation5 + $0x20] sm:$0xff]  ;;  %v2473_v11 = vld [vmem:[#allocation5 + $0x28] sm:$0xff]  ;;  %v2485_v16 = vld [vmem:[#allocation5 + $0x30] sm:$0xff] }
  0x29   :  { %v74_v14 = vand.u32 4294901760, %v2471_v10  ;;  %v77_v15 = vand.u32 4294901760, %v2473_v11  ;;  %v2487_v17 = vld [vmem:[#allocation5 + $0x38] sm:$0xff]  ;;  %v80_v20 = vand.u32 4294901760, %v2485_v16  ;;  %v53_v22 = vld [vmem:[#allocation5 + $0x40] sm:$0xff]  ;;  %v54_v23 = vld [vmem:[#allocation5 + $0x48] sm:$0xff]  ;;  %v2508_v35 = vsub.f32 %v45_v2, %v62_v5 }
  0x2a   :  { %v2475_v12 = vpack.c.bf16 %v65_v6, %v62_v5  ;;  %v2479_v13 = vpack.c.bf16 %v71_v9, %v68_v8  ;;  %v2489_v18 = vld [vmem:[#allocation2] sm:$0xff]  ;;  %v83_v21 = vand.u32 4294901760, %v2487_v17  ;;  %v55_v26 = vld [vmem:[#allocation5 + $0x50] sm:$0xff]  ;;  %v57_v28 = vld [vmem:[#allocation5 + $0x60] sm:$0xff]  ;;  %v86_v30 = vand.u32 4294901760, %v53_v22  ;;  %s1375_s18 = sshll.u32 %s2408_s17, 4  ;;  %s1376_s18 = int_to_ptr.vmem [resolvable:$true] %s1375_s18 }
  0x2b   :  { %v2493_v19 = vpack.c.bf16 %v77_v15, %v74_v14  ;;  %v2500_v24 = vand.u32 4294901760, %v2489_v18  ;;  %v702_v25 = vmul.f32 %v2489_v18, %v2489_v18  ;;  %v56_v27 = vld [vmem:[#allocation5 + $0x58] sm:$0xff]  ;;  %v89_v31 = vand.u32 4294901760, %v54_v23  ;;  %v58_v32 = vld [vmem:[#allocation5 + $0x68] sm:$0xff]  ;;  %v59_v33 = vld [vmem:[#allocation5 + $0x70] sm:$0xff]  ;;  %s2373_s19 = scalar_lea.vmem %s1376_s18, 128  ;;  %p2378_p3 = scmp.lt.s32.totalorder %s1376_s18, %s1376_s18 }
  0x2c   :  { %2013 = vmatpush3.bf16.msra.mxu0 %v2475_v12  ;;  %2157 = vmatpush3.bf16.msra.mxu1 %v2475_v12  ;;  %v2506_v29 = vpack.c.bf16 %v83_v21, %v80_v20  ;;  %v60_v34 = vld [vmem:[#allocation5 + $0x78] sm:$0xff]  ;;  %v2516_v37 = vsub.f32 %v46_v3, %v65_v6  ;;  %v2518_v38 = vsub.f32 %v47_v4, %v68_v8  ;;  %v92_v39 = vand.u32 4294901760, %v55_v26  ;;  %p2374_p2 = scmp.ne.s32.totalorder %s1376_s18, %s2373_s19  ;;  %p2379_p4 = scmp.lt.s32.totalorder %s2373_s19, %s2373_s19 }
  0x2d   :  { %2014 = vmatprep.subr.bf16.mxu0 %v2405_v0  ;;  %2158 = vmatprep.subr.bf16.mxu1 %v2405_v0  ;;  %v2514_v36 = vsub.f32 %v2489_v18, %v2500_v24  ;;  %v95_v40 = vand.u32 4294901760, %v56_v27  ;;  %v2520_v41 = vand.u32 4294901760, %v702_v25  ;;  %v98_v42 = vand.u32 4294901760, %v57_v28 }
  0x2e   :  { %v101_v43 = vand.u32 4294901760, %v58_v32  ;;  %v104_v44 = vand.u32 4294901760, %v59_v33  ;;  %v107_v45 = vand.u32 4294901760, %v60_v34  ;;  %v2524_v46 = vpack.c.bf16 %v89_v31, %v86_v30  ;;  %p2380_p5 = por %p2379_p4, %p2378_p3 }
  0x2f   :  { %v155_v47 = vand.u32 4294901760, %v2508_v35  ;;  %v2849_v48 = vand.u32 4294901760, %v2514_v36  ;;  %v162_v49 = vand.u32 4294901760, %v2516_v37  ;;  %v169_v50 = vand.u32 4294901760, %v2518_v38 }
  0x30   :  { %2016 = vmatpush3.bf16.msra.mxu0 %v2479_v13  ;;  %2160 = vmatpush3.bf16.msra.mxu1 %v2479_v13  ;;  %v2532_v51 = vsub.f32 %v48_v7, %v71_v9  ;;  %v2535_v52 = vsub.f32 %v702_v25, %v2520_v41  ;;  %v2537_v53 = vpack.c.bf16 %v95_v40, %v92_v39  ;;  %p2381_p6 = pnand %p2380_p5, %p2374_p2 }
  0x31   :  { %2017 = vmatprep.subr.bf16.mxu0 %v2405_v0  ;;  %2161 = vmatprep.subr.bf16.mxu1 %v2405_v0  ;;  %v2539_v54 = vpack.c.bf16 %v101_v43, %v98_v42  ;;  %v2541_v55 = vpack.c.bf16 %v107_v45, %v104_v44  ;;  %v156_v56 = vsub.f32 %v2508_v35, %v155_v47 }
  0x32   :  { %v2547_v57 = vsub.f32 %v2471_v10, %v74_v14  ;;  %v2550_v58 = vsub.f32 %v2473_v11, %v77_v15  ;;  %v145_v59 = vsub.f32 %v2514_v36, %v2849_v48  ;;  %v163_v60 = vsub.f32 %v2516_v37, %v162_v49 }
  0x33   :  { %v2559_v61 = vsub.f32 %v2518_v38, %v169_v50  ;;  %v176_v62 = vand.u32 4294901760, %v2532_v51  ;;  %v2848_v63 = vand.u32 4294901760, %v2535_v52  ;;  %v2564_v2 = vsub.f32 %v2485_v16, %v80_v20 }
  0x34   :  { %2019 = vmatpush3.bf16.msra.mxu0 %v2493_v19  ;;  %2163 = vmatpush3.bf16.msra.mxu1 %v2493_v19  ;;  %v2567_v3 = vsub.f32 %v2487_v17, %v83_v21  ;;  %v2569_v4 = vsub.f32 %v53_v22, %v86_v30  ;;  %v2571_v5 = vsub.f32 %v54_v23, %v89_v31  ;;  %v183_v9 = vand.u32 4294901760, %v2547_v57 }
  0x35   :  { %2020 = vmatprep.subr.bf16.mxu0 %v2405_v0  ;;  %2164 = vmatprep.subr.bf16.mxu1 %v2405_v0  ;;  %v2573_v6 = vsub.f32 %v55_v26, %v92_v39  ;;  %v2575_v7 = vsub.f32 %v56_v27, %v95_v40  ;;  %v2577_v8 = vsub.f32 %v57_v28, %v98_v42  ;;  %v157_v15 = vand.u32 4294901760, %v156_v56 }
  0x36   :  { %v2582_v10 = vsub.f32 %v58_v32, %v101_v43  ;;  %v2584_v11 = vsub.f32 %v59_v33, %v104_v44  ;;  %v2586_v14 = vsub.f32 %v60_v34, %v107_v45  ;;  %v164_v16 = vand.u32 4294901760, %v163_v60 }
  0x37   :  { %v177_v17 = vsub.f32 %v2532_v51, %v176_v62  ;;  %v190_v20 = vand.u32 4294901760, %v2550_v58  ;;  %v787_v21 = vsub.f32 %v2535_v52, %v2848_v63  ;;  %v197_v22 = vand.u32 4294901760, %v2564_v2 }
  0x38   :  { %2022 = vmatpush3.bf16.msra.mxu0 %v2506_v29  ;;  %2166 = vmatpush3.bf16.msra.mxu1 %v2506_v29  ;;  %v204_v23 = vand.u32 4294901760, %v2567_v3  ;;  %v211_v25 = vand.u32 4294901760, %v2569_v4  ;;  %v218_v26 = vand.u32 4294901760, %v2571_v5  ;;  %v225_v27 = vand.u32 4294901760, %v2573_v6 }
  0x39   :  { %2023 = vmatprep.subr.bf16.mxu0 %v2405_v0  ;;  %2167 = vmatprep.subr.bf16.mxu1 %v2405_v0  ;;  %v232_v28 = vand.u32 4294901760, %v2575_v7  ;;  %v239_v30 = vand.u32 4294901760, %v2577_v8  ;;  %v246_v31 = vand.u32 4294901760, %v2582_v10  ;;  %v253_v32 = vand.u32 4294901760, %v2584_v11 }
  0x3a   :  { %v2850_v33 = vand.u32 4294901760, %v2586_v14  ;;  %v2607_v34 = vpack.c.bf16 %v162_v49, %v155_v47  ;;  %v2611_v39 = vpack.c.bf16 %v176_v62, %v169_v50  ;;  %v2613_v40 = vpack.c.bf16 %v190_v20, %v183_v9 }
  0x3b   :  { %v2615_v42 = vpack.c.bf16 %v204_v23, %v197_v22  ;;  %v2617_v43 = vpack.c.bf16 %v218_v26, %v211_v25  ;;  %v2619_v44 = vpack.c.bf16 %v232_v28, %v225_v27  ;;  %v2621_v45 = vpack.c.bf16 %v246_v31, %v239_v30 }
  0x3c   :  { %2025 = vmatpush3.bf16.msra.mxu0 %v2524_v46  ;;  %2169 = vmatpush3.bf16.msra.mxu1 %v2524_v46  ;;  %v2627_v47 = vpack.c.bf16 %v2850_v33, %v253_v32  ;;  %v146_v49 = vand.u32 4294901760, %v145_v59  ;;  %v788_v56 = vand.u32 4294901760, %v787_v21  ;;  %v184_v50 = vsub.f32 %v2547_v57, %v183_v9 }
  0x3d   :  { %2026 = vmatprep.subr.bf16.mxu0 %v2405_v0  ;;  %2170 = vmatprep.subr.bf16.mxu1 %v2405_v0  ;;  %v191_v60 = vsub.f32 %v2550_v58, %v190_v20  ;;  %v2036_v62 = vpack.c.bf16 %v164_v16, %v157_v15  ;;  %v171_v63 = vand.u32 4294901760, %v2559_v61  ;;  %v178_v48 = vand.u32 4294901760, %v177_v17 }
  0x3e   :  { %v185_v59 = vand.u32 4294901760, %v184_v50  ;;  %v198_v20 = vsub.f32 %v2564_v2, %v197_v22  ;;  %v205_v33 = vsub.f32 %v2567_v3, %v204_v23  ;;  %v226_v17 = vsub.f32 %v2573_v6, %v225_v27 }
  0x3f   :  { %v192_v21 = vand.u32 4294901760, %v191_v60  ;;  %v2039_v9 = vpack.c.bf16 %v178_v48, %v171_v63  ;;  %v212_v48 = vsub.f32 %v2569_v4, %v211_v25  ;;  %v219_v63 = vsub.f32 %v2571_v5, %v218_v26 }
  0x40   :  { %2028 = vmatpush3.bf16.msra.mxu0 %v2537_v53  ;;  %2172 = vmatpush3.bf16.msra.mxu1 %v2537_v53  ;;  %v199_v15 = vand.u32 4294901760, %v198_v20  ;;  %v206_v16 = vand.u32 4294901760, %v205_v33  ;;  %v240_v25 = vsub.f32 %v2577_v8, %v239_v30  ;;  %v227_v33 = vand.u32 4294901760, %v226_v17 }
  0x41   :  { %2029 = vmatprep.subr.bf16.mxu0 %v2405_v0  ;;  %2173 = vmatprep.subr.bf16.mxu1 %v2405_v0  ;;  %v2042_v61 = vpack.c.bf16 %v192_v21, %v185_v59  ;;  %v213_v23 = vand.u32 4294901760, %v212_v48  ;;  %v247_v27 = vsub.f32 %v2582_v10, %v246_v31  ;;  %v254_v30 = vsub.f32 %v2584_v11, %v253_v32 }
  0x42   :  { %v2045_v22 = vpack.c.bf16 %v206_v16, %v199_v15  ;;  %v241_v60 = vand.u32 4294901760, %v240_v25  ;;  %v2851_v59 = vand.u32 4294901760, %v2586_v14  ;;  %v2063_v15 = vpack.c.bf16 %v2532_v51, %v2518_v38 }
  0x43   :  { %v2072_v38 = vpack.c.bf16 %v2571_v5, %v2569_v4  ;;  %v2075_v51 = vpack.c.bf16 %v2575_v7, %v2573_v6 }
  0x44   :  { %2031 = vmatpush3.bf16.msra.mxu0 %v2539_v54  ;;  %2175 = vmatpush3.bf16.msra.mxu1 %v2539_v54  ;;  %v261_v21 = vsub.f32 %v2586_v14, %v2851_v59 }
  0x45   :  { %2032 = vmatprep.subr.bf16.mxu0 %v2405_v0  ;;  %2176 = vmatprep.subr.bf16.mxu1 %v2405_v0 }
  0x46   :  { %v262_v20 = vand.u32 4294901760, %v261_v21 }
  0x48   :  { %2034 = vmatpush3.bf16.msra.mxu0 %v2541_v55  ;;  %2178 = vmatpush3.bf16.msra.mxu1 %v2541_v55 }
  0x49   :  { %2035 = vmatprep.subr.bf16.mxu0 %v2405_v0  ;;  %2179 = vmatprep.subr.bf16.mxu1 %v2405_v0 }
  0x4b   :  { %1624 = vmatmul.mubr.f32.vlgmr.msra.gmra.mrb[0].mxu0 %v146_v49  ;;  %1834 = vmatmul.mubr.f32.vlgmr.msra.gmra.mrb[0].mxu1 %v788_v56  ;;  %v220_v49 = vand.u32 4294901760, %v219_v63  ;;  %v233_v56 = vsub.f32 %v2575_v7, %v232_v28 }
  0x4c   :  { %2037 = vmatpush3.bf16.msra.mxu0 %v2036_v62  ;;  %2181 = vmatpush3.bf16.msra.mxu1 %v2036_v62  ;;  %v248_v62 = vand.u32 4294901760, %v247_v27 }
  0x4d   :  { %2038 = vmatprep.subr.bf16.mxu0 %v2405_v0  ;;  %2182 = vmatprep.subr.bf16.mxu1 %v2405_v0  ;;  %v2048_v26 = vpack.c.bf16 %v220_v49, %v213_v23  ;;  %v234_v50 = vand.u32 4294901760, %v233_v56 }
  0x4e   :  { %1658 = vmatprep.mubr.msk.f32.mxu0 %vm2406_vm0, %v2407_v1  ;;  %1868 = vmatprep.mubr.msk.f32.mxu1 %vm2406_vm0, %v2407_v1  ;;  %v2054_v31 = vpack.c.bf16 %v248_v62, %v241_v60 }
  0x4f   :  { %v2051_v28 = vpack.c.bf16 %v234_v50, %v227_v33 }
  0x50   :  { %2040 = vmatpush3.bf16.msra.mxu0 %v2039_v9  ;;  %2184 = vmatpush3.bf16.msra.mxu1 %v2039_v9  ;;  %v255_v9 = vand.u32 4294901760, %v254_v30 }
  0x51   :  { %2041 = vmatprep.subr.bf16.mxu0 %v2405_v0  ;;  %2185 = vmatprep.subr.bf16.mxu1 %v2405_v0 }
  0x52   :  { %v2057_v32 = vpack.c.bf16 %v262_v20, %v255_v9 }
  0x54   :  { %2043 = vmatpush3.bf16.msra.mxu0 %v2042_v61  ;;  %2187 = vmatpush3.bf16.msra.mxu1 %v2042_v61  ;;  %v2060_v61 = vpack.c.bf16 %v2516_v37, %v2508_v35  ;;  %v2066_v35 = vpack.c.bf16 %v2550_v58, %v2547_v57  ;;  %v2069_v37 = vpack.c.bf16 %v2567_v3, %v2564_v2  ;;  %v2852_v2 = vand.u32 4294901760, %v2514_v36 }
  0x55   :  { %2044 = vmatprep.subr.bf16.mxu0 %v2405_v0  ;;  %2188 = vmatprep.subr.bf16.mxu1 %v2405_v0  ;;  %v2078_v57 = vpack.c.bf16 %v2582_v10, %v2577_v8  ;;  %v2081_v58 = vpack.c.bf16 %v2586_v14, %v2584_v11  ;;  %v2853_v3 = vand.u32 4294901760, %v2535_v52 }
  0x58   :  { %2046 = vmatpush3.bf16.msra.mxu0 %v2045_v22  ;;  %2190 = vmatpush3.bf16.msra.mxu1 %v2045_v22 }
  0x59   :  { %2047 = vmatprep.subr.bf16.mxu0 %v2405_v0  ;;  %2191 = vmatprep.subr.bf16.mxu1 %v2405_v0 }
  0x5c   :  { %2049 = vmatpush3.bf16.msra.mxu0 %v2048_v26  ;;  %2193 = vmatpush3.bf16.msra.mxu1 %v2048_v26 }
  0x5d   :  { %2050 = vmatprep.subr.bf16.mxu0 %v2405_v0  ;;  %2194 = vmatprep.subr.bf16.mxu1 %v2405_v0 }
  0x60   :  { %2052 = vmatpush3.bf16.msra.mxu0 %v2051_v28  ;;  %2196 = vmatpush3.bf16.msra.mxu1 %v2051_v28 }
  0x61   :  { %2053 = vmatprep.subr.bf16.mxu0 %v2405_v0  ;;  %2197 = vmatprep.subr.bf16.mxu1 %v2405_v0 }
  0x64   :  { %2055 = vmatpush3.bf16.msra.mxu0 %v2054_v31  ;;  %2199 = vmatpush3.bf16.msra.mxu1 %v2054_v31 }
  0x65   :  { %2056 = vmatprep.subr.bf16.mxu0 %v2405_v0  ;;  %2200 = vmatprep.subr.bf16.mxu1 %v2405_v0 }
  0x68   :  { %2058 = vmatpush3.bf16.msra.mxu0 %v2057_v32  ;;  %2202 = vmatpush3.bf16.msra.mxu1 %v2057_v32 }
  0x69   :  { %2059 = vmatprep.subr.bf16.mxu0 %v2405_v0  ;;  %2203 = vmatprep.subr.bf16.mxu1 %v2405_v0 }
  0x6b   :  { %1659 = vmatmul.mubr.f32.vlgmr.msra.gmra.mrb[0].mxu0 %v2500_v24  ;;  %1869 = vmatmul.mubr.f32.vlgmr.msra.gmra.mrb[0].mxu1 %v2520_v41 }
  0x6c   :  { %2061 = vmatpush3.bf16.msra.mxu0 %v2060_v61  ;;  %2205 = vmatpush3.bf16.msra.mxu1 %v2060_v61 }
  0x6d   :  { %2062 = vmatprep.subr.bf16.mxu0 %v2405_v0  ;;  %2206 = vmatprep.subr.bf16.mxu1 %v2405_v0 }
  0x6e   :  { %1693 = vmatprep.mubr.msk.f32.mxu0 %vm2406_vm0, %v2407_v1  ;;  %1903 = vmatprep.mubr.msk.f32.mxu1 %vm2406_vm0, %v2407_v1 }
  0x70   :  { %2064 = vmatpush3.bf16.msra.mxu0 %v2063_v15  ;;  %2208 = vmatpush3.bf16.msra.mxu1 %v2063_v15 }
  0x71   :  { %2065 = vmatprep.subr.bf16.mxu0 %v2405_v0  ;;  %2209 = vmatprep.subr.bf16.mxu1 %v2405_v0 }
  0x74   :  { %2067 = vmatpush3.bf16.msra.mxu0 %v2066_v35  ;;  %2211 = vmatpush3.bf16.msra.mxu1 %v2066_v35 }
  0x75   :  { %2068 = vmatprep.subr.bf16.mxu0 %v2405_v0  ;;  %2212 = vmatprep.subr.bf16.mxu1 %v2405_v0 }
  0x78   :  { %2070 = vmatpush3.bf16.msra.mxu0 %v2069_v37  ;;  %2214 = vmatpush3.bf16.msra.mxu1 %v2069_v37 }
  0x79   :  { %2071 = vmatprep.subr.bf16.mxu0 %v2405_v0  ;;  %2215 = vmatprep.subr.bf16.mxu1 %v2405_v0 }
  0x7c   :  { %2073 = vmatpush3.bf16.msra.mxu0 %v2072_v38  ;;  %2217 = vmatpush3.bf16.msra.mxu1 %v2072_v38 }
  0x7d   :  { %2074 = vmatprep.subr.bf16.mxu0 %v2405_v0  ;;  %2218 = vmatprep.subr.bf16.mxu1 %v2405_v0 }
  0x80   :  { %2076 = vmatpush3.bf16.msra.mxu0 %v2075_v51  ;;  %2220 = vmatpush3.bf16.msra.mxu1 %v2075_v51 }
  0x81   :  { %2077 = vmatprep.subr.bf16.mxu0 %v2405_v0  ;;  %2221 = vmatprep.subr.bf16.mxu1 %v2405_v0 }
  0x84   :  { %2079 = vmatpush3.bf16.msra.mxu0 %v2078_v57  ;;  %2223 = vmatpush3.bf16.msra.mxu1 %v2078_v57 }
  0x85   :  { %2080 = vmatprep.subr.bf16.mxu0 %v2405_v0  ;;  %2224 = vmatprep.subr.bf16.mxu1 %v2405_v0 }
  0x88   :  { %2082 = vmatpush3.bf16.msra.mxu0 %v2081_v58  ;;  %2226 = vmatpush3.bf16.msra.mxu1 %v2081_v58 }
  0x89   :  { %2083 = vmatprep.subr.bf16.mxu0 %v2405_v0  ;;  %2227 = vmatprep.subr.bf16.mxu1 %v2405_v0 }
  0x8b   :  { %1694 = vmatmul.mubr.f32.vlgmr.msra.gmra.mrb[0].mxu0 %v2514_v36  ;;  %1904 = vmatmul.mubr.f32.vlgmr.msra.gmra.mrb[0].mxu1 %v2535_v52 }
  0x8c   :  { %2085 = vmatpush3.bf16.msra.mxu0 %v2475_v12  ;;  %2229 = vmatpush3.bf16.msra.mxu1 %v2475_v12 }
  0x8d   :  { %2086 = vmatprep.subr.bf16.mxu0 %v2405_v0  ;;  %2230 = vmatprep.subr.bf16.mxu1 %v2405_v0 }
  0x8e   :  { %1728 = vmatprep.mubr.msk.f32.mxu0 %vm2406_vm0, %v2407_v1  ;;  %1938 = vmatprep.mubr.msk.f32.mxu1 %vm2406_vm0, %v2407_v1 }
  0x90   :  { %2088 = vmatpush3.bf16.msra.mxu0 %v2479_v13  ;;  %2232 = vmatpush3.bf16.msra.mxu1 %v2479_v13 }
  0x91   :  { %2089 = vmatprep.subr.bf16.mxu0 %v2405_v0  ;;  %2233 = vmatprep.subr.bf16.mxu1 %v2405_v0 }
  0x94   :  { %2091 = vmatpush3.bf16.msra.mxu0 %v2493_v19  ;;  %2235 = vmatpush3.bf16.msra.mxu1 %v2493_v19 }
  0x95   :  { %2092 = vmatprep.subr.bf16.mxu0 %v2405_v0  ;;  %2236 = vmatprep.subr.bf16.mxu1 %v2405_v0 }
  0x98   :  { %2094 = vmatpush3.bf16.msra.mxu0 %v2506_v29  ;;  %2238 = vmatpush3.bf16.msra.mxu1 %v2506_v29 }
  0x99   :  { %2095 = vmatprep.subr.bf16.mxu0 %v2405_v0  ;;  %2239 = vmatprep.subr.bf16.mxu1 %v2405_v0 }
  0x9c   :  { %2097 = vmatpush3.bf16.msra.mxu0 %v2524_v46  ;;  %2241 = vmatpush3.bf16.msra.mxu1 %v2524_v46 }
  0x9d   :  { %2098 = vmatprep.subr.bf16.mxu0 %v2405_v0  ;;  %2242 = vmatprep.subr.bf16.mxu1 %v2405_v0 }
  0xa0   :  { %2100 = vmatpush3.bf16.msra.mxu0 %v2537_v53  ;;  %2244 = vmatpush3.bf16.msra.mxu1 %v2537_v53 }
  0xa1   :  { %2101 = vmatprep.subr.bf16.mxu0 %v2405_v0  ;;  %2245 = vmatprep.subr.bf16.mxu1 %v2405_v0 }
  0xa4   :  { %2103 = vmatpush3.bf16.msra.mxu0 %v2539_v54  ;;  %2247 = vmatpush3.bf16.msra.mxu1 %v2539_v54 }
  0xa5   :  { %2104 = vmatprep.subr.bf16.mxu0 %v2405_v0  ;;  %2248 = vmatprep.subr.bf16.mxu1 %v2405_v0 }
  0xa8   :  { %2106 = vmatpush3.bf16.msra.mxu0 %v2541_v55  ;;  %2250 = vmatpush3.bf16.msra.mxu1 %v2541_v55 }
  0xa9   :  { %2107 = vmatprep.subr.bf16.mxu0 %v2405_v0  ;;  %2251 = vmatprep.subr.bf16.mxu1 %v2405_v0 }
  0xab   :  { %1729 = vmatmul.mubr.f32.vlgmr.msra.gmra.mrb[0].mxu0 %v2852_v2  ;;  %1939 = vmatmul.mubr.f32.vlgmr.msra.gmra.mrb[0].mxu1 %v2853_v3 }
  0xac   :  { %2109 = vmatpush3.bf16.msra.mxu0 %v2607_v34  ;;  %2253 = vmatpush3.bf16.msra.mxu1 %v2607_v34 }
  0xad   :  { %2110 = vmatprep.subr.bf16.mxu0 %v2405_v0  ;;  %2254 = vmatprep.subr.bf16.mxu1 %v2405_v0 }
  0xae   :  { %1763 = vmatprep.mubr.msk.f32.mxu0 %vm2406_vm0, %v2407_v1  ;;  %1973 = vmatprep.mubr.msk.f32.mxu1 %vm2406_vm0, %v2407_v1 }
  0xb0   :  { %2112 = vmatpush3.bf16.msra.mxu0 %v2611_v39  ;;  %2256 = vmatpush3.bf16.msra.mxu1 %v2611_v39 }
  0xb1   :  { %2113 = vmatprep.subr.bf16.mxu0 %v2405_v0  ;;  %2257 = vmatprep.subr.bf16.mxu1 %v2405_v0 }
  0xb4   :  { %2115 = vmatpush3.bf16.msra.mxu0 %v2613_v40  ;;  %2259 = vmatpush3.bf16.msra.mxu1 %v2613_v40 }
  0xb5   :  { %2116 = vmatprep.subr.bf16.mxu0 %v2405_v0  ;;  %2260 = vmatprep.subr.bf16.mxu1 %v2405_v0 }
  0xb8   :  { %2118 = vmatpush3.bf16.msra.mxu0 %v2615_v42  ;;  %2262 = vmatpush3.bf16.msra.mxu1 %v2615_v42 }
  0xb9   :  { %2119 = vmatprep.subr.bf16.mxu0 %v2405_v0  ;;  %2263 = vmatprep.subr.bf16.mxu1 %v2405_v0 }
  0xbc   :  { %2121 = vmatpush3.bf16.msra.mxu0 %v2617_v43  ;;  %2265 = vmatpush3.bf16.msra.mxu1 %v2617_v43 }
  0xbd   :  { %2122 = vmatprep.subr.bf16.mxu0 %v2405_v0  ;;  %2266 = vmatprep.subr.bf16.mxu1 %v2405_v0 }
  0xc0   :  { %2124 = vmatpush3.bf16.msra.mxu0 %v2619_v44  ;;  %2268 = vmatpush3.bf16.msra.mxu1 %v2619_v44 }
  0xc1   :  { %2125 = vmatprep.subr.bf16.mxu0 %v2405_v0  ;;  %2269 = vmatprep.subr.bf16.mxu1 %v2405_v0 }
  0xc4   :  { %2127 = vmatpush3.bf16.msra.mxu0 %v2621_v45  ;;  %2271 = vmatpush3.bf16.msra.mxu1 %v2621_v45 }
  0xc5   :  { %2128 = vmatprep.subr.bf16.mxu0 %v2405_v0  ;;  %2272 = vmatprep.subr.bf16.mxu1 %v2405_v0 }
  0xc8   :  { %2130 = vmatpush3.bf16.msra.mxu0 %v2627_v47  ;;  %2274 = vmatpush3.bf16.msra.mxu1 %v2627_v47 }
  0xc9   :  { %2131 = vmatprep.subr.bf16.mxu0 %v2405_v0  ;;  %2275 = vmatprep.subr.bf16.mxu1 %v2405_v0 }
  0xcb   :  { %1764 = vmatmul.mubr.f32.vlgmr.msra.gmra.mrb[0].mxu0 %v2500_v24  ;;  %1974 = vmatmul.mubr.f32.vlgmr.msra.gmra.mrb[0].mxu1 %v2520_v41 }
  0xcc   :  { %2133 = vmatpush3.bf16.msra.mxu0 %v2475_v12  ;;  %2277 = vmatpush3.bf16.msra.mxu1 %v2475_v12 }
  0xcd   :  { %2134 = vmatprep.subr.bf16.mxu0 %v2405_v0  ;;  %2278 = vmatprep.subr.bf16.mxu1 %v2405_v0 }
  0xce   :  { %1798 = vmatprep.mubr.msk.f32.mxu0 %vm2406_vm0, %v2407_v1  ;;  %2008 = vmatprep.mubr.msk.f32.mxu1 %vm2406_vm0, %v2407_v1 }
  0xd0   :  { %2136 = vmatpush3.bf16.msra.mxu0 %v2479_v13  ;;  %2280 = vmatpush3.bf16.msra.mxu1 %v2479_v13 }
  0xd1   :  { %2137 = vmatprep.subr.bf16.mxu0 %v2405_v0  ;;  %2281 = vmatprep.subr.bf16.mxu1 %v2405_v0 }
  0xd4   :  { %2139 = vmatpush3.bf16.msra.mxu0 %v2493_v19  ;;  %2283 = vmatpush3.bf16.msra.mxu1 %v2493_v19 }
  0xd5   :  { %2140 = vmatprep.subr.bf16.mxu0 %v2405_v0  ;;  %2284 = vmatprep.subr.bf16.mxu1 %v2405_v0 }
  0xd8   :  { %2142 = vmatpush3.bf16.msra.mxu0 %v2506_v29  ;;  %2286 = vmatpush3.bf16.msra.mxu1 %v2506_v29 }
  0xd9   :  { %2143 = vmatprep.subr.bf16.mxu0 %v2405_v0  ;;  %2287 = vmatprep.subr.bf16.mxu1 %v2405_v0 }
  0xdc   :  { %2145 = vmatpush3.bf16.msra.mxu0 %v2524_v46  ;;  %2289 = vmatpush3.bf16.msra.mxu1 %v2524_v46 }
  0xdd   :  { %2146 = vmatprep.subr.bf16.mxu0 %v2405_v0  ;;  %2290 = vmatprep.subr.bf16.mxu1 %v2405_v0 }
  0xe0   :  { %2148 = vmatpush3.bf16.msra.mxu0 %v2537_v53  ;;  %2292 = vmatpush3.bf16.msra.mxu1 %v2537_v53 }
  0xe1   :  { %2149 = vmatprep.subr.bf16.mxu0 %v2405_v0  ;;  %2293 = vmatprep.subr.bf16.mxu1 %v2405_v0 }
  0xe4   :  { %2151 = vmatpush3.bf16.msra.mxu0 %v2539_v54  ;;  %2295 = vmatpush3.bf16.msra.mxu1 %v2539_v54  ;;  %v1385_v54 = vld [vmem:[%s2844_s1] ss:$0 sm:$0xff] }
  0xe5   :  { %2152 = vmatprep.subr.bf16.mxu0 %v2405_v0  ;;  %2296 = vmatprep.subr.bf16.mxu1 %v2405_v0 }
  0xe8   :  { %2154 = vmatpush3.bf16.msra.mxu0 %v2541_v55  ;;  %2298 = vmatpush3.bf16.msra.mxu1 %v2541_v55 }
  0xeb   :  { %1799 = vmatmul.mubr.f32.vlgmr.msra.gmra.mrb[0].mxu0 %v2500_v24  ;;  %2009 = vmatmul.mubr.f32.vlgmr.msra.gmra.mrb[0].mxu1 %v2520_v41  ;;  %v1386_v41 = vld [vmem:[%s2845_s2] ss:$0 sm:$0xff] }
 0x1be   :  { %v698_v1 = vpop.f32.mrb[0].mxu0  ;;  %v1340_v12 = vpop.f32.mrb[0].mxu1 }
 0x1bf   :  { %v1344_v13 = vmul.f32 0.03125, %v698_v1  ;;  %v1800_v19 = vpop.f32.mrb[1].mxu0  ;;  %v2010_v29 = vpop.f32.mrb[1].mxu1  ;;  %v1345_v46 = vmul.f32 0.03125, %v1340_v12 }
 0x1c1   :  { %v1346_v36 = vmul.f32 %v1344_v13, %v1344_v13  ;;  %v1352_v0 = vsub.f32 %v2489_v18, %v1344_v13 }
 0x1c3   :  { %v1347_v52 = vsub.f32 %v1345_v46, %v1346_v36  ;;  %v1359_v55 = vmul.f32 %v1385_v54, %v1352_v0 }
 0x1c5   :  { %v1348_v53 = vadd.f32 1e-05, %v1347_v52 }
 0x1c7   :  { %2327 = vrsqrt.f32 %v1348_v53 }
 0x1d1   :  { %v2328_v24 = vpop.eup %2327 }
 0x1d2   :  { %v1360_v4 = vmul.f32 %v2328_v24, %v1359_v55 }
 0x1d4   :  { %v1367_v5 = vadd.f32 %v1386_v41, %v1360_v4 }
 0x1d6   :  { %1368 = vst [vmem:[#allocation7] sm:$0xff] %v1367_v5 }
 0x1d7   :  { %2384 = shalt.err (!%p2381_p6)
}
 0x1d8   :  { %s2385_s21 = scalar_lea.hbm %s2847_s4, 128 }
 0x1d9   :  { %p2386_p7 = scmp.ne.s32.totalorder %s2847_s4, %s2385_s21  ;;  %p2389_p8 = scmp.lt.u32.totalorder %s2385_s21, %s2847_s4 }
 0x1db   :  { %p2391_p9 = pnand %p2389_p8, %p2386_p7 }
 0x1dd   :  { %2394 = shalt.err (!%p2391_p9)
}
 0x1de   :  { %1378 = dma.vmem_to_hbm [thread:$0]  %s1376_s18, 128, %s2847_s4, [#allocation4]  }
 0x1df   :  { %2399 = dma.done.wait [#allocation4], 128  }
 0x1e0   :  { %2400 = vsyncadd [#allocation4], 4294967168 }
 0x1e1   :  { %1382 = vsyncpa [#allocation3], 1 }
 0x1e2   :  { %1383 = vsyncpa [#allocation6], 1 }
 0x1e3   :  { %1384 = vsyncpa [#allocation4], 1 }

</bundles_post_ra>
